<compile_context>
chip_gen: v7x
topology: tpu7x:2x2x1
jax: 0.10.0
libtpu: 0.0.40
codegen_flags: <defaults>
</compile_context>

<pallas_src>
import functools

import jax
import jax.numpy as jnp
from jax.experimental import pallas as pl
from jax.experimental.pallas import tpu as pltpu


def _make_kernel(stride, expand_ratio):
    n_phase = stride * stride
    inv = 1.0 / float(n_phase)

    def kernel(x_ref, o_ref):
        # x_ref: (s*s, Bblk, TH, Wo, Cin)   o_ref: (Bblk, TH, Wo, Cout)
        acc = x_ref[0].astype(jnp.float32)
        for p in range(1, n_phase):          # static unroll, no strided slices
            acc = acc + x_ref[p].astype(jnp.float32)
        pooled = acc * inv
        if expand_ratio > 1:
            # Faithful to torch.cat([x] + [x.mul(0)] * (r - 1), dim=1):
            # use pooled * 0 (not literal zeros) so NaN/Inf propagate like x.mul(0).
            slab = jnp.concatenate(
                [pooled] + [pooled * 0.0] * (expand_ratio - 1), axis=-1)
        else:
            slab = pooled
        o_ref[...] = slab.astype(o_ref.dtype)   # one unmasked full-block store

    return kernel


def _choose_tiles(n, ho, wo, c_in, c_out, stride, itemsize, target_bytes=2 << 20):
    """Pick (batch_block, h_block) so the in+out block is ~target (<= 2 MiB)."""
    row_bytes = (stride * stride * c_in + c_out) * wo * itemsize  # per output row
    img_bytes = row_bytes * ho

    if img_bytes >= target_bytes:
        b_blk = 1
        th = 1
        for t in range(1, ho + 1):
            if ho % t == 0 and t * row_bytes <= target_bytes:
                th = t
    else:
        th = ho
        b_blk = 1
        for b in range(1, n + 1):
            if n % b == 0 and b * img_bytes <= target_bytes:
                b_blk = b

    # Keep at least 2 grid steps when possible (even split across v7x's 2 TCs).
    if (n // b_blk) * (ho // th) < 2:
        if n >= 2:
            b_blk = n // 2 if n % 2 == 0 else 1
        elif ho >= 2:
            for t in range(ho // 2, 0, -1):
                if ho % t == 0:
                    th = t
                    break
    return b_blk, th


@functools.partial(jax.jit, static_argnums=(1, 2))
def downsample(x, n_out, stride):
    """Pallas equivalent of Downsample(nIn, nOut, stride).forward(x); x is NCHW."""
    n, n_in, h, w = x.shape
    assert n_out % n_in == 0, "nOut must be a multiple of nIn"
    assert h % stride == 0 and w % stride == 0
    ho, wo = h // stride, w // stride
    expand_ratio = n_out // n_in
    s2 = stride * stride

    # Layout plumbing (wrapper side): NCHW -> (s*s, N, Ho, Wo, Cin) so pooling
    # phases are a leading axis and channels land on the lane axis.
    xr = x.reshape(n, n_in, ho, stride, wo, stride)
    xp = jnp.transpose(xr, (3, 5, 0, 2, 4, 1)).reshape(s2, n, ho, wo, n_in)

    b_blk, th = _choose_tiles(n, ho, wo, n_in, n_out, stride,
                              jnp.dtype(x.dtype).itemsize)

    kernel = _make_kernel(stride, expand_ratio)
    out_nhwc = pl.pallas_call(
        kernel,
        out_shape=jax.ShapeDtypeStruct((n, ho, wo, n_out), x.dtype),
        grid_spec=pltpu.PrefetchScalarGridSpec(
            num_scalar_prefetch=0,
            grid=(n // b_blk, ho // th),
            in_specs=[
                pl.BlockSpec((s2, b_blk, th, wo, n_in),
                             lambda b, hh: (0, b, hh, 0, 0)),
            ],
            out_specs=pl.BlockSpec((b_blk, th, wo, n_out),
                                   lambda b, hh: (b, hh, 0, 0)),
        ),
        compiler_params=pltpu.CompilerParams(
            dimension_semantics=("parallel", "parallel"),
            vmem_limit_bytes=32 * 1024 * 1024,
        ),
    )(xp)

    # Back to the module's NCHW output layout. (In a full NHWC network the two
    # wrapper transposes would be dropped and the kernel used end-to-end.)
    return jnp.transpose(out_nhwc, (0, 3, 1, 2))


def _reference(x, n_out, stride):
    n, n_in, h, w = x.shape
    xr = x.reshape(n, n_in, h // stride, stride, w // stride, stride)
    pooled = xr.mean(axis=(3, 5))
    if n_out == n_in:
        return pooled
    zeros = jnp.zeros((n, n_out - n_in, h // stride, w // stride), dtype=x.dtype)
    return jnp.concatenate([pooled, zeros], axis=1)


if __name__ == "__main__":
    key = jax.random.PRNGKey(0)

    # Module config: Downsample(nIn=4, nOut=8, stride=2) -> expand_ratio = 2
    x = jax.random.normal(key, (2, 4, 16, 16), dtype=jnp.float32)
    y = downsample(x, 8, 2)
    jax.block_until_ready(y)
    assert y.shape == (2, 8, 8, 8), y.shape
    assert jnp.allclose(y, _reference(x, 8, 2), atol=1e-5, rtol=1e-5)

    # expand_ratio = 1 path (pure average pooling)
    y2 = downsample(x, 4, 2)
    jax.block_until_ready(y2)
    assert jnp.allclose(y2, _reference(x, 4, 2), atol=1e-5, rtol=1e-5)

    print("KERNEL_OK")
</pallas_src>

<mosaic_0001>
module attributes {stable_mosaic.version = 11 : i64} {
  func.func @kernel(%arg0: i32, %arg1: i32, %arg2: memref<4x1x8x8x4xf32, #tpu.memory_space<vmem>>, %arg3: memref<1x8x8x8xf32, #tpu.memory_space<vmem>>) attributes {dimension_semantics = [#tpu.dimension_semantics<parallel>, #tpu.dimension_semantics<parallel>], iteration_bounds = array<i64: 2, 1>, scalar_prefetch = 0 : i64, scratch_operands = 0 : i64, tpu.core_type = #tpu.core_type<tc>, window_params = [{transform_indices = @transform_0, window_bounds = array<i64: 4, 1, 8, 8, 4>}, {transform_indices = @transform_1, window_bounds = array<i64: 1, 8, 8, 8>}]} {
    %c0 = arith.constant 0 : index
    %c0_0 = arith.constant 0 : index
    %c0_1 = arith.constant 0 : index
    %c0_2 = arith.constant 0 : index
    %c0_3 = arith.constant 0 : index
    %0 = vector.load %arg2[%c0, %c0_0, %c0_1, %c0_2, %c0_3] : memref<4x1x8x8x4xf32, #tpu.memory_space<vmem>>, vector<1x1x8x8x4xf32>
    %1 = vector.shape_cast %0 : vector<1x1x8x8x4xf32> to vector<1x8x8x4xf32>
    %c1 = arith.constant 1 : index
    %c0_4 = arith.constant 0 : index
    %c0_5 = arith.constant 0 : index
    %c0_6 = arith.constant 0 : index
    %c0_7 = arith.constant 0 : index
    %2 = vector.load %arg2[%c1, %c0_4, %c0_5, %c0_6, %c0_7] : memref<4x1x8x8x4xf32, #tpu.memory_space<vmem>>, vector<1x1x8x8x4xf32>
    %3 = vector.shape_cast %2 : vector<1x1x8x8x4xf32> to vector<1x8x8x4xf32>
    %4 = arith.addf %1, %3 : vector<1x8x8x4xf32>
    %c2 = arith.constant 2 : index
    %c0_8 = arith.constant 0 : index
    %c0_9 = arith.constant 0 : index
    %c0_10 = arith.constant 0 : index
    %c0_11 = arith.constant 0 : index
    %5 = vector.load %arg2[%c2, %c0_8, %c0_9, %c0_10, %c0_11] : memref<4x1x8x8x4xf32, #tpu.memory_space<vmem>>, vector<1x1x8x8x4xf32>
    %6 = vector.shape_cast %5 : vector<1x1x8x8x4xf32> to vector<1x8x8x4xf32>
    %7 = arith.addf %4, %6 : vector<1x8x8x4xf32>
    %c3 = arith.constant 3 : index
    %c0_12 = arith.constant 0 : index
    %c0_13 = arith.constant 0 : index
    %c0_14 = arith.constant 0 : index
    %c0_15 = arith.constant 0 : index
    %8 = vector.load %arg2[%c3, %c0_12, %c0_13, %c0_14, %c0_15] : memref<4x1x8x8x4xf32, #tpu.memory_space<vmem>>, vector<1x1x8x8x4xf32>
    %9 = vector.shape_cast %8 : vector<1x1x8x8x4xf32> to vector<1x8x8x4xf32>
    %10 = arith.addf %7, %9 : vector<1x8x8x4xf32>
    %cst = arith.constant 2.500000e-01 : f32
    %11 = vector.broadcast %cst : f32 to vector<1x8x8x4xf32>
    %12 = arith.mulf %10, %11 : vector<1x8x8x4xf32>
    %cst_16 = arith.constant 0.000000e+00 : f32
    %13 = vector.broadcast %cst_16 : f32 to vector<1x8x8x4xf32>
    %14 = arith.mulf %12, %13 : vector<1x8x8x4xf32>
    %15 = tpu.concatenate %12, %14 in 3 : vector<1x8x8x4xf32>, vector<1x8x8x4xf32> -> vector<1x8x8x8xf32>
    %c0_17 = arith.constant 0 : index
    %c0_18 = arith.constant 0 : index
    %c0_19 = arith.constant 0 : index
    %c0_20 = arith.constant 0 : index
    %16 = vector.load %arg3[%c0_17, %c0_18, %c0_19, %c0_20] : memref<1x8x8x8xf32, #tpu.memory_space<vmem>>, vector<1x8x8x8xf32>
    tpu.vector_store %arg3[%c0_17, %c0_18, %c0_19, %c0_20], %15 {strides = array<i32>} : memref<1x8x8x8xf32, #tpu.memory_space<vmem>>, vector<1x8x8x8xf32>,
    return
  }
  func.func @transform_0(%arg0: i32, %arg1: i32) -> (i32, i32, i32, i32, i32) {
    %c0_i32 = arith.constant 0 : i32
    %c0_i32_0 = arith.constant 0 : i32
    %c0_i32_1 = arith.constant 0 : i32
    %c0_i32_2 = arith.constant 0 : i32
    return %c0_i32, %arg0, %arg1, %c0_i32_0, %c0_i32_1 : i32, i32, i32, i32, i32
  }
  func.func @transform_1(%arg0: i32, %arg1: i32) -> (i32, i32, i32, i32) {
    %c0_i32 = arith.constant 0 : i32
    %c0_i32_0 = arith.constant 0 : i32
    %c0_i32_1 = arith.constant 0 : i32
    return %arg0, %arg1, %c0_i32, %c0_i32_0 : i32, i32, i32, i32
  }
}

</mosaic_0001>

<bundles_post_ra>
// kernel: downsample.1
= control target key start
LH: loop header
LB: loop body
LE: loop exit
PB: predicated region body
PF: predicated region fallthrough
CT: control target
= control target key end

     0   :  { %s650_s6 = smov 0   ;;  %s652_s7 = smov 0   ;;  %s834_s0 = inlined_call_operand.vmem [shape: f32[4,2,8,8,4], index: 0, kind: input, shape index: {}]   ;;  %s835_s1 = inlined_call_operand.vmem [shape: f32[2,8,8,8], index: 1, kind: output, shape index: {}]  }
   0x1   :  { %s654_s8 = smov 0   ;;  %s656_s9 = smov 0  }
   0x2   :  { %s658_s10 = smov 0  }
   0x3 LB: > { %s23_s11 = sadd.s32 1, %s633_s9  ;;  %p39_p1 = scmp.ne.s32.totalorder %s625_s7, %s621_s6  ;;  %s637_s10 = sphi %s658_s10, %s11_s10   ;;  %s633_s9 = sphi %s656_s9, %s839_s9   ;;  %s629_s8 = sphi %s654_s8, %s838_s8   ;;  %s625_s7 = sphi %s652_s7, %s837_s7   ;;  %s621_s6 = sphi %s650_s6, %s836_s6  }
   0x4   : > { %p25_p0 = scmp.ge.s32.totalorder %s23_s11, 2  ;;  %p40_p2 = scmp.eq.s32.totalorder %s637_s10, 0 }
   0x5   : > { %s32_s13 = sadd.s32 1, %s625_s7  ;;  %p522_p5 = scmp.ge.s32.totalorder %s637_s10, 2 }
   0x6   : > { %s841_s11 = smov (%p25_p0, %s23_s11), 0  ;;  %p41_p3 = por %p40_p2, %p39_p1 }
   0x7   : > { %s27_s12 = ssub.s32 %s633_s9, %s841_s11  ;;  %93 = sbr.rel (%p522_p5) target bundleno = 34 (0x22), region = 16 }
   0x8   : > { %p30_p4 = scmp.eq.s32.totalorder %s27_s12, 0 }
   0xa   : > { %s685_s14 = scalar_select %p30_p4, %s625_s7, %s32_s13  }
   0xe   : > { %96 = sbr.rel (!%p41_p3) target bundleno = 34 (0x22), region = 20  ;;  %s98_s15 = sand.u32 (%p41_p3), 1, %s625_s7  }
   0xf   : > { %s556_s16 = sshll.u32 (%p41_p3), %s633_s9, 6  ;;  %s523_s17 = sshll.u32 (%p41_p3), %s98_s15, 8 }
  0x10   : > { %s693_s20 = scalar_lea.vmem (%p41_p3), %s834_s0, %s556_s16  ;;  %s698_s21 = scalar_lea.vmem (%p41_p3), [#allocation2], %s523_s17 }
  0x11   : > { %v195_v0 = vld [vmem:[%s693_s20] sm:$0xff] (%p41_p3)  ;;  %v197_v1 = vld [vmem:[%s693_s20 + $0x8] sm:$0xff] (%p41_p3)  ;;  %v199_v2 = vld [vmem:[%s693_s20 + $0x10] sm:$0xff] (%p41_p3) }
  0x12   : > { %196 = vst [vmem:[%s698_s21] sm:$0xff] (%p41_p3), %v195_v0  ;;  %198 = vst [vmem:[%s698_s21 + $0x8] sm:$0xff] (%p41_p3), %v197_v1  ;;  %v201_v3 = vld [vmem:[%s693_s20 + $0x18] sm:$0xff] (%p41_p3)  ;;  %v203_v4 = vld [vmem:[%s693_s20 + $0x20] sm:$0xff] (%p41_p3) }
  0x13   : > { %200 = vst [vmem:[%s698_s21 + $0x10] sm:$0xff] (%p41_p3), %v199_v2  ;;  %v205_v5 = vld [vmem:[%s693_s20 + $0x28] sm:$0xff] (%p41_p3)  ;;  %202 = vst [vmem:[%s698_s21 + $0x18] sm:$0xff] (%p41_p3), %v201_v3  ;;  %v207_v6 = vld [vmem:[%s693_s20 + $0x30] sm:$0xff] (%p41_p3) }
  0x14   : > { %204 = vst [vmem:[%s698_s21 + $0x20] sm:$0xff] (%p41_p3), %v203_v4  ;;  %206 = vst [vmem:[%s698_s21 + $0x28] sm:$0xff] (%p41_p3), %v205_v5  ;;  %v209_v7 = vld [vmem:[%s693_s20 + $0x38] sm:$0xff] (%p41_p3)  ;;  %v211_v8 = vld [vmem:[%s693_s20 + $0x80] sm:$0xff] (%p41_p3) }
  0x15   : > { %208 = vst [vmem:[%s698_s21 + $0x30] sm:$0xff] %v207_v6  ;;  %210 = vst [vmem:[%s698_s21 + $0x38] sm:$0xff] %v209_v7  ;;  %v213_v9 = vld [vmem:[%s693_s20 + $0x88] sm:$0xff]  ;;  %v215_v10 = vld [vmem:[%s693_s20 + $0x90] sm:$0xff] }
  0x16   : > { %212 = vst [vmem:[%s698_s21 + $0x40] sm:$0xff] %v211_v8  ;;  %v217_v11 = vld [vmem:[%s693_s20 + $0x98] sm:$0xff]  ;;  %214 = vst [vmem:[%s698_s21 + $0x48] sm:$0xff] %v213_v9  ;;  %v219_v12 = vld [vmem:[%s693_s20 + $0xa0] sm:$0xff] }
  0x17   : > { %216 = vst [vmem:[%s698_s21 + $0x50] sm:$0xff] %v215_v10  ;;  %218 = vst [vmem:[%s698_s21 + $0x58] sm:$0xff] %v217_v11  ;;  %v221_v13 = vld [vmem:[%s693_s20 + $0xa8] sm:$0xff]  ;;  %v223_v14 = vld [vmem:[%s693_s20 + $0xb0] sm:$0xff] }
  0x18   : > { %220 = vst [vmem:[%s698_s21 + $0x60] sm:$0xff] %v219_v12  ;;  %222 = vst [vmem:[%s698_s21 + $0x68] sm:$0xff] %v221_v13  ;;  %v225_v15 = vld [vmem:[%s693_s20 + $0xb8] sm:$0xff]  ;;  %v227_v16 = vld [vmem:[%s693_s20 + $0x100] sm:$0xff] }
  0x19   : > { %224 = vst [vmem:[%s698_s21 + $0x70] sm:$0xff] %v223_v14  ;;  %v229_v17 = vld [vmem:[%s693_s20 + $0x108] sm:$0xff]  ;;  %226 = vst [vmem:[%s698_s21 + $0x78] sm:$0xff] %v225_v15  ;;  %v231_v18 = vld [vmem:[%s693_s20 + $0x110] sm:$0xff] }
  0x1a   : > { %228 = vst [vmem:[%s698_s21 + $0x80] sm:$0xff] %v227_v16  ;;  %230 = vst [vmem:[%s698_s21 + $0x88] sm:$0xff] %v229_v17  ;;  %v233_v19 = vld [vmem:[%s693_s20 + $0x118] sm:$0xff]  ;;  %v235_v20 = vld [vmem:[%s693_s20 + $0x120] sm:$0xff] }
  0x1b   : > { %232 = vst [vmem:[%s698_s21 + $0x90] sm:$0xff] %v231_v18  ;;  %234 = vst [vmem:[%s698_s21 + $0x98] sm:$0xff] %v233_v19  ;;  %v237_v21 = vld [vmem:[%s693_s20 + $0x128] sm:$0xff]  ;;  %v239_v22 = vld [vmem:[%s693_s20 + $0x130] sm:$0xff] }
  0x1c   : > { %236 = vst [vmem:[%s698_s21 + $0xa0] sm:$0xff] %v235_v20  ;;  %v241_v23 = vld [vmem:[%s693_s20 + $0x138] sm:$0xff]  ;;  %238 = vst [vmem:[%s698_s21 + $0xa8] sm:$0xff] %v237_v21  ;;  %v243_v24 = vld [vmem:[%s693_s20 + $0x180] sm:$0xff] }
  0x1d   : > { %240 = vst [vmem:[%s698_s21 + $0xb0] sm:$0xff] %v239_v22  ;;  %242 = vst [vmem:[%s698_s21 + $0xb8] sm:$0xff] %v241_v23  ;;  %v245_v25 = vld [vmem:[%s693_s20 + $0x188] sm:$0xff]  ;;  %v247_v26 = vld [vmem:[%s693_s20 + $0x190] sm:$0xff] }
  0x1e   : > { %244 = vst [vmem:[%s698_s21 + $0xc0] sm:$0xff] %v243_v24  ;;  %246 = vst [vmem:[%s698_s21 + $0xc8] sm:$0xff] %v245_v25  ;;  %v249_v27 = vld [vmem:[%s693_s20 + $0x198] sm:$0xff]  ;;  %v251_v28 = vld [vmem:[%s693_s20 + $0x1a0] sm:$0xff] }
  0x1f   : > { %248 = vst [vmem:[%s698_s21 + $0xd0] sm:$0xff] %v247_v26  ;;  %v253_v29 = vld [vmem:[%s693_s20 + $0x1a8] sm:$0xff]  ;;  %250 = vst [vmem:[%s698_s21 + $0xd8] sm:$0xff] %v249_v27  ;;  %v255_v30 = vld [vmem:[%s693_s20 + $0x1b0] sm:$0xff] }
  0x20   : > { %252 = vst [vmem:[%s698_s21 + $0xe0] sm:$0xff] %v251_v28  ;;  %254 = vst [vmem:[%s698_s21 + $0xe8] sm:$0xff] %v253_v29  ;;  %v257_v31 = vld [vmem:[%s693_s20 + $0x1b8] sm:$0xff] }
  0x21   : > { %256 = vst [vmem:[%s698_s21 + $0xf0] sm:$0xff] %v255_v30  ;;  %258 = vst [vmem:[%s698_s21 + $0xf8] sm:$0xff] %v257_v31 }
  0x22 PF: > { %p526_p6 = scmp.ge.s32.totalorder %s637_s10, 1  ;;  %p263_p7 = scmp.lt.s32.totalorder %s637_s10, 3 }
  0x24   : > { %p264_p8 = pnand %p526_p6, %p263_p7 }
  0x25   : > { %s270_s22 = sand.u32 (!%p264_p8), 1, %s621_s6   ;;  %s639_s25 = smov (!%p264_p8), 4   ;;  %vm411_vm0 = vcmask (!%p264_p8), 31744   ;;  %vm420_vm1 = vcmask (!%p264_p8), 64512  }
  0x26   : > { %267 = sbr.rel (%p264_p8) target bundleno = 181 (0xb5), region = 58  ;;  %s527_s23 = sshll.u32 (!%p264_p8), %s270_s22, 8 }
  0x27   : > { %s764_s24 = scalar_lea.vmem (!%p264_p8), [#allocation2], %s527_s23  ;;  %p295_p9 = scmp.lt.s32.totalorder (!%p264_p8), %s629_s8, 1 }
  0x28   : > { %v306_v32 = vld [vmem:[%s764_s24 + $0x10] sm:$0xff] (!%p264_p8)  ;;  %v304_v36 = vld [vmem:[%s764_s24] sm:$0xff] (!%p264_p8)  ;;  %v307_v41 = vld [vmem:[%s764_s24 + $0x18] sm:$0xff] (!%p264_p8) }
  0x29   : > { %v532_v33 = vld [vmem:[%s764_s24 + $0x50] sm:$0xff] (!%p264_p8)  ;;  %v530_v37 = vld [vmem:[%s764_s24 + $0x40] sm:$0xff] (!%p264_p8)  ;;  %v533_v44 = vld [vmem:[%s764_s24 + $0x58] sm:$0xff] (!%p264_p8) }
  0x2a   : > { %v540_v34 = vld [vmem:[%s764_s24 + $0x90] sm:$0xff] (!%p264_p8)  ;;  %v323_v35 = vadd.f32 (!%p264_p8), %v532_v33, %v306_v32  ;;  %v321_v39 = vadd.f32 (!%p264_p8), %v530_v37, %v304_v36  ;;  %v538_v40 = vld [vmem:[%s764_s24 + $0x80] sm:$0xff] (!%p264_p8)  ;;  %v541_v45 = vld [vmem:[%s764_s24 + $0x98] sm:$0xff] (!%p264_p8)  ;;  %v324_v47 = vadd.f32 (!%p264_p8), %v533_v44, %v307_v41 }
  0x2b   : > { %v548_v38 = vld [vmem:[%s764_s24 + $0xd0] sm:$0xff] (!%p264_p8)  ;;  %v546_v43 = vld [vmem:[%s764_s24 + $0xc0] sm:$0xff] (!%p264_p8)  ;;  %v305_v48 = vld [vmem:[%s764_s24 + $0x8] sm:$0xff] (!%p264_p8) }
  0x2c   : > { %v340_v42 = vadd.f32 (!%p264_p8), %v540_v34, %v323_v35  ;;  %v338_v46 = vadd.f32 (!%p264_p8), %v538_v40, %v321_v39  ;;  %v531_v49 = vld [vmem:[%s764_s24 + $0x48] sm:$0xff] (!%p264_p8)  ;;  %v549_v52 = vld [vmem:[%s764_s24 + $0xd8] sm:$0xff] (!%p264_p8)  ;;  %v341_v57 = vadd.f32 (!%p264_p8), %v541_v45, %v324_v47  ;;  %v308_v61 = vld [vmem:[%s764_s24 + $0x20] sm:$0xff] (!%p264_p8) }
  0x2d   : > { %v539_v50 = vld [vmem:[%s764_s24 + $0x88] sm:$0xff]  ;;  %v322_v53 = vadd.f32 %v531_v49, %v305_v48  ;;  %v534_v1 = vld [vmem:[%s764_s24 + $0x60] sm:$0xff]  ;;  %v311_v7 = vld [vmem:[%s764_s24 + $0x38] sm:$0xff]  ;;  %s843_s8 = smov (!%p295_p9, %s629_s8), 1 }
  0x2e   : > { %v357_v51 = vadd.f32 %v548_v38, %v340_v42  ;;  %v309_v54 = vld [vmem:[%s764_s24 + $0x28] sm:$0xff]  ;;  %v355_v56 = vadd.f32 %v546_v43, %v338_v46  ;;  %v542_v2 = vld [vmem:[%s764_s24 + $0xa0] sm:$0xff]  ;;  %v358_v4 = vadd.f32 %v549_v52, %v341_v57  ;;  %v325_v6 = vadd.f32 %v534_v1, %v308_v61  ;;  %v537_v8 = vld [vmem:[%s764_s24 + $0x78] sm:$0xff]  ;;  %s557_s26 = sshll.u32 %s843_s8, 6 }
  0x2f   : > { %v535_v55 = vld [vmem:[%s764_s24 + $0x68] sm:$0xff]  ;;  %v339_v63 = vadd.f32 %v539_v50, %v322_v53  ;;  %v545_v9 = vld [vmem:[%s764_s24 + $0xb8] sm:$0xff]  ;;  %v550_v12 = vld [vmem:[%s764_s24 + $0xe0] sm:$0xff]  ;;  %v328_v13 = vadd.f32 %v537_v8, %v311_v7  ;;  %s302_s29 = scalar_lea.vmem %s835_s1, %s557_s26 }
  0x30   : > { %v547_v58 = vld [vmem:[%s764_s24 + $0xc8] sm:$0xff]  ;;  %v326_v59 = vadd.f32 %v535_v55, %v309_v54  ;;  %v365_v62 = vmul.f32 0.25, %v357_v51  ;;  %v363_v3 = vmul.f32 0.25, %v355_v56  ;;  %v310_v14 = vld [vmem:[%s764_s24 + $0x30] sm:$0xff]  ;;  %v366_v17 = vmul.f32 0.25, %v358_v4  ;;  %v553_v20 = vld [vmem:[%s764_s24 + $0xf8] sm:$0xff] }
  0x31   : > { %v543_v60 = vld [vmem:[%s764_s24 + $0xa8] sm:$0xff]  ;;  %v356_v11 = vadd.f32 %v547_v58, %v339_v63  ;;  %v536_v15 = vld [vmem:[%s764_s24 + $0x70] sm:$0xff]  ;;  %v342_v19 = vadd.f32 %v542_v2, %v325_v6  ;;  %v345_v23 = vadd.f32 %v545_v9, %v328_v13 }
  0x32   : > { %v551_v0 = vld [vmem:[%s764_s24 + $0xe8] sm:$0xff]  ;;  %v343_v5 = vadd.f32 %v543_v60, %v326_v59  ;;  %v373_v10 = vmul.f32 0.0, %v365_v62  ;;  %v371_v16 = vmul.f32 0.0, %v363_v3  ;;  %v544_v21 = vld [vmem:[%s764_s24 + $0xb0] sm:$0xff]  ;;  %v327_v24 = vadd.f32 %v536_v15, %v310_v14 }
  0x33   : > { %v364_v22 = vmul.f32 0.25, %v356_v11  ;;  %v374_v25 = vmul.f32 0.0, %v366_v17  ;;  %v359_v27 = vadd.f32 %v550_v12, %v342_v19  ;;  %v552_v28 = vld [vmem:[%s764_s24 + $0xf0] sm:$0xff]  ;;  %v362_v30 = vadd.f32 %v553_v20, %v345_v23 }
  0x34   : > { %v360_v18 = vadd.f32 %v551_v0, %v343_v5  ;;  %391 = vrot.lane.b32.xlu1 %v373_v10, %s639_s25  ;;  %387 = vrot.lane.b32.xlu0 %v371_v16, %s639_s25  ;;  %v344_v31 = vadd.f32 %v544_v21, %v327_v24 }
  0x35   : > { %v372_v29 = vmul.f32 0.0, %v364_v22  ;;  %v367_v32 = vmul.f32 0.25, %v359_v27  ;;  %v370_v34 = vmul.f32 0.25, %v362_v30 }
  0x36   : > { %v368_v26 = vmul.f32 0.25, %v360_v18  ;;  %v361_v35 = vadd.f32 %v552_v28, %v344_v31 }
  0x37   : > { %v375_v36 = vmul.f32 0.0, %v367_v32  ;;  %v378_v38 = vmul.f32 0.0, %v370_v34 }
  0x38   : > { %393 = vrot.lane.b32.xlu1 %v374_v25, %s639_s25  ;;  %v376_v33 = vmul.f32 0.0, %v368_v26  ;;  %389 = vrot.lane.b32.xlu0 %v372_v29, %s639_s25  ;;  %v369_v37 = vmul.f32 0.25, %v361_v35 }
  0x3a   : > { %v377_v39 = vmul.f32 0.0, %v369_v37 }
  0x3c   : > { %397 = vrot.lane.b32.xlu1 %v376_v33, %s639_s25  ;;  %395 = vrot.lane.b32.xlu0 %v375_v36, %s639_s25 }
  0x40   : > { %401 = vrot.lane.b32.xlu1 %v378_v38, %s639_s25  ;;  %399 = vrot.lane.b32.xlu0 %v377_v39, %s639_s25 }
  0xa6   : > { %v392_v40 = vpop.permute.xlu1 %391  ;;  %v388_v42 = vpop.permute.xlu0 %387 }
  0xa7   : > { %v414_v41 = vsel %vm411_vm0, %v365_v62, %v392_v40  ;;  %v412_v43 = vsel %vm411_vm0, %v363_v3, %v388_v42 }
  0xa8   : > { %423 = vst.msk [vmem:[%s302_s29 + $0x10] sm:$0xff] %vm420_vm1, %v414_v41  ;;  %421 = vst.msk [vmem:[%s302_s29] sm:$0xff] %vm420_vm1, %v412_v43 }
  0xaa   : > { %v394_v44 = vpop.permute.xlu1 %393  ;;  %v390_v46 = vpop.permute.xlu0 %389 }
  0xab   : > { %v415_v45 = vsel %vm411_vm0, %v366_v17, %v394_v44  ;;  %v413_v47 = vsel %vm411_vm0, %v364_v22, %v390_v46 }
  0xac   : > { %424 = vst.msk [vmem:[%s302_s29 + $0x18] sm:$0xff] %vm420_vm1, %v415_v45  ;;  %422 = vst.msk [vmem:[%s302_s29 + $0x8] sm:$0xff] %vm420_vm1, %v413_v47 }
  0xae   : > { %v398_v48 = vpop.permute.xlu1 %397  ;;  %v396_v50 = vpop.permute.xlu0 %395 }
  0xaf   : > { %v417_v49 = vsel %vm411_vm0, %v368_v26, %v398_v48  ;;  %v416_v51 = vsel %vm411_vm0, %v367_v32, %v396_v50 }
  0xb0   : > { %426 = vst.msk [vmem:[%s302_s29 + $0x28] sm:$0xff] %vm420_vm1, %v417_v49  ;;  %425 = vst.msk [vmem:[%s302_s29 + $0x20] sm:$0xff] %vm420_vm1, %v416_v51 }
  0xb2   : > { %v402_v52 = vpop.permute.xlu1 %401  ;;  %v400_v54 = vpop.permute.xlu0 %399 }
  0xb3   : > { %v419_v53 = vsel %vm411_vm0, %v370_v34, %v402_v52  ;;  %v418_v55 = vsel %vm411_vm0, %v369_v37, %v400_v54 }
  0xb4   : > { %428 = vst.msk [vmem:[%s302_s29 + $0x38] sm:$0xff] %vm420_vm1, %v419_v53  ;;  %427 = vst.msk [vmem:[%s302_s29 + $0x30] sm:$0xff] %vm420_vm1, %v418_v55 }
  0xb5 PF: > { %s11_s10 = sadd.s32 1, %s637_s10   ;;  %s836_s6 = smov %s625_s7 }
  0xb6   : > { %p8_p10 = scmp.ge.s32.totalorder %s11_s10, 4   ;;  %s837_s7 = smov %s685_s14 }
  0xb7   : > { %s838_s8 = smov %s633_s9  ;;  %s839_s9 = smov %s841_s11 }
  0xb8   :  { %10 = sbr.rel (!%p8_p10) target bundleno = 3 (0x3), region = 100 }

</bundles_post_ra>
